<compile_context>
chip_gen: v7x
topology: tpu7x:2x2x1
jax: 0.10.0
libtpu: 0.0.40
codegen_flags: <defaults>
</compile_context>

<pallas_src>
import math
import functools

import jax
import jax.numpy as jnp
from jax.experimental import pallas as pl
from jax.experimental.pallas import tpu as pltpu


def _hash_u32(x):
    """32-bit integer finalizer (lowbias32-style) — good enough for dropout masks."""
    x = x ^ (x >> 16)
    x = x * jnp.uint32(0x7FEB352D)
    x = x ^ (x >> 15)
    x = x * jnp.uint32(0x846CA68B)
    x = x ^ (x >> 16)
    return x


def _pe_dropout_kernel(seed_ref, x_ref, pe_ref, o_ref, *, p, training, rows_total):
    """out = dropout(x + pe) on one (TS, GD) tile.

    seed_ref: (1,) int32 scalar-prefetch (SMEM)
    x_ref   : (TS, GD) tile of batch element b = program_id(0), row-tile s = program_id(1)
    pe_ref  : (TS, GD) tile of the (grouped) PE table (shared across batch)
    o_ref   : (TS, GD) output tile
    """
    y = x_ref[...] + pe_ref[...]

    if training and p > 0.0:
        b = pl.program_id(0)
        s = pl.program_id(1)
        ts, gd = o_ref.shape
        # Counter-based hash PRNG in the integer domain. Each element gets a
        # globally-unique counter (batch, row-tile and column all folded in),
        # so the mask does not repeat across sequence tiles or batch elements.
        rows = jax.lax.broadcasted_iota(jnp.int32, (ts, gd), 0).astype(jnp.uint32)
        cols = jax.lax.broadcasted_iota(jnp.int32, (ts, gd), 1).astype(jnp.uint32)
        base = (b * rows_total + s * ts).astype(jnp.uint32)
        flat = (rows + base) * jnp.uint32(gd) + cols
        key = _hash_u32(seed_ref[0].astype(jnp.uint32) + jnp.uint32(0x9E3779B9))
        h = _hash_u32(flat ^ key)
        # Integer-domain threshold: keep with probability ~(1 - p).
        thresh = jnp.uint32(min(int(round(p * 4294967296.0)), 4294967295))
        keep = h >= thresh
        scale = jnp.asarray(1.0 / (1.0 - p), y.dtype)
        y = y * (keep.astype(y.dtype) * scale)

    o_ref[...] = y.astype(o_ref.dtype)


def make_positional_encoding(seq_len: int, d_model: int) -> jnp.ndarray:
    """Standard sinusoidal PE table of shape (seq_len, d_model)."""
    position = jnp.arange(seq_len, dtype=jnp.float32)[:, None]
    div_term = jnp.exp(
        jnp.arange(0, d_model, 2, dtype=jnp.float32) * (-math.log(10000.0) / d_model)
    )
    pe = jnp.zeros((seq_len, d_model), jnp.float32)
    pe = pe.at[:, 0::2].set(jnp.sin(position * div_term))
    pe = pe.at[:, 1::2].set(jnp.cos(position * div_term))
    return pe


def _grouping_factor(S: int, D: int) -> int:
    """Smallest g such that g*D is a multiple of 128 (lane-dense), if it divides S."""
    if D % 128 == 0:
        return 1
    g = math.lcm(D, 128) // D
    return g if S % g == 0 else 1


def _pick_row_tile(total_rows: int, row_bytes: int, target_bytes: int = 1 << 20) -> int:
    """Largest row-tile with ~<= target bytes that is legal under the (8,128) rule
    (row count must be a multiple of 8 or equal to the full extent)."""
    max_rows = max(1, target_bytes // max(1, row_bytes))
    if total_rows <= max_rows:
        return total_rows
    for ts in range(min(total_rows, max_rows), 0, -1):
        if total_rows % ts == 0 and ts % 8 == 0:
            return ts
    return total_rows  # no legal divisor fits the budget -> single block


def positional_encoding_forward(x, pe_full, *, p=0.1, training=True, seed=0):
    """Pallas forward: dropout(x + pe[:x.shape[1], :])."""
    B, S, D = x.shape
    pe = pe_full[:S, :].astype(x.dtype)  # slice to input seq length (plain-JAX glue)

    # Lane-dense layout: group G consecutive positions -> last dim multiple of 128.
    G = _grouping_factor(S, D)
    S_g, GD = S // G, G * D
    x_g = x.reshape(B, S_g, GD)
    pe_g = pe.reshape(S_g, GD)

    # Tile the (grouped) sequence axis: ~1 MiB tiles, double-buffered by Pallas;
    # 2x(x)+2x(pe)+2x(out) tiles stay far below scoped VMEM on all generations.
    itemsize = jnp.dtype(x.dtype).itemsize
    TS = _pick_row_tile(S_g, GD * itemsize)
    grid = (B, S_g // TS)

    tile_bytes = TS * GD * itemsize
    vmem_limit = int(min(32 * 1024 * 1024, max(4 * 1024 * 1024, 8 * tile_bytes)))

    seed_arr = jnp.array([seed], dtype=jnp.int32)
    kernel = functools.partial(
        _pe_dropout_kernel, p=float(p), training=bool(training), rows_total=S_g
    )

    cost = pl.CostEstimate(
        flops=B * S * D,
        transcendentals=0,
        bytes_accessed=3 * B * S * D * itemsize,
    )

    out_g = pl.pallas_call(
        kernel,
        out_shape=jax.ShapeDtypeStruct((B, S_g, GD), x.dtype),
        grid_spec=pltpu.PrefetchScalarGridSpec(
            num_scalar_prefetch=1,
            grid=grid,
            in_specs=[
                # batch dim squeezed (None) -> kernel sees rank-2 (TS, GD) tiles
                pl.BlockSpec((None, TS, GD), lambda b, s, seed: (b, s, 0)),
                pl.BlockSpec((TS, GD), lambda b, s, seed: (s, 0)),
            ],
            out_specs=pl.BlockSpec((None, TS, GD), lambda b, s, seed: (b, s, 0)),
        ),
        compiler_params=pltpu.CompilerParams(
            dimension_semantics=("parallel", "parallel"),
            vmem_limit_bytes=vmem_limit,
        ),
        cost_estimate=cost,
    )(seed_arr, x_g, pe_g)

    return out_g.reshape(B, S, D)


if __name__ == "__main__":
    # Module config
    d_model = 32
    seq_len = 16          # max sequence length baked into the PE table
    dropout_p = 0.1

    # Small deterministic input: (batch, seq, d_model) with seq <= seq_len
    B, S = 2, 8
    key = jax.random.PRNGKey(0)
    x = jax.random.normal(key, (B, S, d_model), dtype=jnp.float32)

    pe_full = make_positional_encoding(seq_len, d_model)
    ref = x + pe_full[None, :S, :]

    # Eval mode (no dropout): compare against plain-JAX reference.
    out_eval = jax.block_until_ready(
        positional_encoding_forward(x, pe_full, p=dropout_p, training=False)
    )
    assert out_eval.shape == x.shape and out_eval.dtype == x.dtype
    assert jnp.allclose(out_eval, ref, atol=1e-5, rtol=1e-5)

    # Training mode: every element must be either 0 (dropped) or ref / (1 - p).
    out_train = jax.block_until_ready(
        positional_encoding_forward(x, pe_full, p=dropout_p, training=True, seed=0)
    )
    assert out_train.shape == x.shape and out_train.dtype == x.dtype
    scaled = ref / (1.0 - dropout_p)
    ok = jnp.isclose(out_train, scaled, atol=1e-5, rtol=1e-5) | (out_train == 0.0)
    assert bool(ok.all())
    drop_frac = float(jnp.mean(out_train == 0.0))
    assert 0.0 < drop_frac < 0.5  # roughly p with B*S*D = 512 samples

    print("KERNEL_OK")
</pallas_src>

<mosaic_0001>
module attributes {stable_mosaic.version = 11 : i64} {
  func.func @_pe_dropout_kernel(%arg0: i32, %arg1: i32, %arg2: memref<1xi32, #tpu.memory_space<smem>>, %arg3: memref<1x2x128xf32, #tpu.memory_space<vmem>>, %arg4: memref<2x128xf32, #tpu.memory_space<vmem>>, %arg5: memref<1x2x128xf32, #tpu.memory_space<vmem>>) attributes {dimension_semantics = [#tpu.dimension_semantics<parallel>, #tpu.dimension_semantics<parallel>], iteration_bounds = array<i64: 2, 1>, scalar_prefetch = 1 : i64, scratch_operands = 0 : i64, tpu.core_type = #tpu.core_type<tc>, window_params = [{transform_indices = @transform_0, window_bounds = array<i64: 1, 2, 128>}, {transform_indices = @transform_1, window_bounds = array<i64: 2, 128>}, {transform_indices = @transform_2, window_bounds = array<i64: 1, 2, 128>}]} {
    %c0 = arith.constant 0 : index
    %c0_0 = arith.constant 0 : index
    %c0_1 = arith.constant 0 : index
    %0 = vector.load %arg3[%c0, %c0_0, %c0_1] : memref<1x2x128xf32, #tpu.memory_space<vmem>>, vector<1x2x128xf32>
    %1 = vector.shape_cast %0 : vector<1x2x128xf32> to vector<2x128xf32>
    %c0_2 = arith.constant 0 : index
    %c0_3 = arith.constant 0 : index
    %2 = vector.load %arg4[%c0_2, %c0_3] : memref<2x128xf32, #tpu.memory_space<vmem>>, vector<2x128xf32>
    %3 = arith.addf %1, %2 : vector<2x128xf32>
    %c0_4 = arith.constant 0 : index
    %c0_5 = arith.constant 0 : index
    %c0_6 = arith.constant 0 : index
    %4 = vector.load %arg5[%c0_4, %c0_5, %c0_6] : memref<1x2x128xf32, #tpu.memory_space<vmem>>, vector<1x2x128xf32>
    %5 = vector.shape_cast %4 : vector<1x2x128xf32> to vector<2x128xf32>
    %6 = vector.shape_cast %3 : vector<2x128xf32> to vector<1x2x128xf32>
    tpu.vector_store %arg5[%c0_4, %c0_5, %c0_6], %6 {strides = array<i32>} : memref<1x2x128xf32, #tpu.memory_space<vmem>>, vector<1x2x128xf32>,
    return
  }
  func.func @transform_0(%arg0: i32, %arg1: i32, %arg2: memref<1xi32, #tpu.memory_space<smem>>) -> (i32, i32, i32) {
    %c0_i32 = arith.constant 0 : i32
    %c0_i32_0 = arith.constant 0 : i32
    return %arg0, %arg1, %c0_i32 : i32, i32, i32
  }
  func.func @transform_1(%arg0: i32, %arg1: i32, %arg2: memref<1xi32, #tpu.memory_space<smem>>) -> (i32, i32) {
    %c0_i32 = arith.constant 0 : i32
    %c0_i32_0 = arith.constant 0 : i32
    return %arg1, %c0_i32 : i32, i32
  }
  func.func @transform_2(%arg0: i32, %arg1: i32, %arg2: memref<1xi32, #tpu.memory_space<smem>>) -> (i32, i32, i32) {
    %c0_i32 = arith.constant 0 : i32
    %c0_i32_0 = arith.constant 0 : i32
    return %arg0, %arg1, %c0_i32 : i32, i32, i32
  }
}

</mosaic_0001>

<bundles_post_ra>
// kernel: tpu_custom_call.1
= control target key start
LH: loop header
LB: loop body
LE: loop exit
PB: predicated region body
PF: predicated region fallthrough
CT: control target
= control target key end

     0   :  { %9 = vsyncpa [#allocation5], 0  ;;  %s696_s0 = inlined_call_operand.<no memory space> [shape: s32[1], index: 0, kind: input, shape index: {}]   ;;  %s697_s1 = inlined_call_operand.hbm [shape: f32[2,2,128], index: 1, kind: input, shape index: {}]   ;;  %s698_s2 = inlined_call_operand.vmem [shape: f32[2,128], index: 2, kind: input, shape index: {}]   ;;  %s699_s3 = inlined_call_operand.hbm [shape: f32[2,2,128], index: 3, kind: output, shape index: {}]  }
   0x1   :  { %11 = vsyncpa [#allocation5 + $0x1], 0 }
   0x2   :  { %12 = vsyncpa [#allocation6], 0 }
   0x3   :  { %14 = vsyncpa [#allocation6 + $0x1], 0  ;;  %s521_s12 = smov 0   ;;  %s523_s13 = smov 0  }
   0x4   :  { %s525_s14 = smov 0   ;;  %s527_s0 = smov 0  }
   0x5   :  { %s529_s15 = smov 0   ;;  %s531_s16 = smov 0  }
   0x6 LB: > { %s309_s17 = sadd.s32 4294967295, %s497_s16   ;;  %s310_s18 = sadd.s32 4294967294, %s497_s16   ;;  %s497_s16 = sphi %s531_s16, %s20_s16   ;;  %s493_s15 = sphi %s529_s15, %s715_s15   ;;  %s489_s0 = sphi %s527_s0, %s714_s0   ;;  %s485_s14 = sphi %s525_s14, %s713_s14   ;;  %s481_s13 = sphi %s523_s13, %s712_s13   ;;  %s477_s12 = sphi %s521_s12, %s711_s12  }
   0x7   : > { %s32_s19 = sadd.s32 1, %s493_s15  ;;  %s41_s20 = sadd.s32 1, %s485_s14 }
   0x8   : > { %p34_p0 = scmp.ge.s32.totalorder %s32_s19, 2  ;;  %p48_p1 = scmp.ne.s32.totalorder %s485_s14, %s481_s13 }
   0x9   : > { %p49_p2 = scmp.eq.s32.totalorder %s497_s16, 0  ;;  %p54_p3 = scmp.ne.s32.totalorder %s481_s13, %s477_s12 }
   0xa   : > { %s717_s19 = smov (%p34_p0, %s32_s19), 0  ;;  %p55_p5 = scmp.eq.s32.totalorder %s309_s17, 0 }
   0xb   : > { %p562_p4 = por %p49_p2, %p48_p1  ;;  %s36_s22 = ssub.s32 %s493_s15, %s717_s19 }
   0xc   : > { %p106_p6 = scmp.eq.s32.totalorder %s309_s17, 1  ;;  %p39_p7 = scmp.eq.s32.totalorder %s36_s22, 0 }
   0xd   : > { %p568_p8 = por %p55_p5, %p54_p3  ;;  %p112_p10 = scmp.eq.s32.totalorder %s310_s18, 1 }
   0xe   : > { %p572_p9 = por %p106_p6, %p48_p1  ;;  %p335_p13 = scmp.lt.s32.totalorder %s497_s16, 2 }
   0xf   : > { %s577_s25 = scalar_select %p39_p7, %s485_s14, %s41_s20  }
  0x10   : > { %s703_s24 = scalar_select %p572_p9, 1, 0 }
  0x11   : > { %p579_p11 = por %p112_p10, %p54_p3  ;;  %s139_s27 = sand.u32 1, %s485_s14  }
  0x12   : > { %s314_s28 = sshll.u32 %s139_s27, 1  ;;  %s315_s29 = sshll.u32 %s493_s15, 5 }
  0x13   : > { %s704_s26 = scalar_select %p579_p11, 1, 0 }
  0x14   : > { %s590_s5 = scalar_lea.hbm %s697_s1, %s315_s29  ;;  %s143_s6 = scalar_lea.vmem [#allocation4], %s314_s28 }
  0x15   : > { %s151_s7 = sshll.u32 %s143_s6, 4  ;;  %p596_p0 = pnand %p335_p13, %p562_p4  ;;  %s592_s7 = int_to_ptr.vmem [resolvable:$true] %s151_s7 }
  0x16   : > { %s140_s9 = scalar_lea.sflag [#allocation5], %s139_s27  ;;  %s385_s10 = scalar_lea.hbm %s590_s5, 32 }
  0x17   : > { %p386_p3 = scmp.ne.s32.totalorder %s590_s5, %s385_s10  ;;  %p387_p5 = pneg %p596_p0 }
  0x18   : > { %s390_s18 = scalar_lea.hbm %s697_s1, 64  ;;  %p391_p4 = scmp.lt.u32.totalorder %s590_s5, %s697_s1 }
  0x19   : > { %p388_p6 = pnand %p387_p5, %p386_p3  ;;  %p392_p10 = scmp.lt.u32.totalorder %s390_s18, %s385_s10 }
  0x1a   : > { %p394_p12 = scmp.lt.u32.totalorder %s385_s10, %s590_s5 }
  0x1b   : > { %p389_p7 = pneg %p388_p6  ;;  %p393_p13 = por %p392_p10, %p391_p4 }
  0x1d   : > { %p395_p1 = por %p394_p12, %p393_p13 }
  0x1f   : > { %p396_p2 = pnand %p395_p1, %p389_p7 }
  0x21   : > { %399 = shalt.err (!%p396_p2)
}
  0x22   : > { %s400_s22 = scalar_lea.vmem %s592_s7, 32  ;;  %s499_s27 = smov [#allocation4]  }
  0x23   : > { %p401_p3 = scmp.ne.s32.totalorder %s592_s7, %s400_s22  ;;  %s405_s28 = sshll.u32 %s499_s27, 4  ;;  %s406_s28 = int_to_ptr.vmem [resolvable:$false] %s405_s28 }
  0x24   : > { %s407_s29 = scalar_lea.vmem %s406_s28, 64  ;;  %p408_p9 = scmp.lt.s32.totalorder %s592_s7, %s406_s28 }
  0x25   : > { %p403_p6 = pnand %p401_p3, %p387_p5  ;;  %p409_p4 = scmp.lt.s32.totalorder %s407_s29, %s400_s22 }
  0x27   : > { %p404_p11 = pneg %p403_p6  ;;  %p410_p10 = por %p409_p4, %p408_p9 }
  0x29   : > { %p411_p12 = pnand %p410_p10, %p404_p11 }
  0x2b   : > { %414 = shalt.err (!%p411_p12)
}
  0x2c   : > { %330 = dma.hbm_to_vmem [thread:$0]  (!%p596_p0), %s590_s5, 32, %s592_s7, %s140_s9  }
  0x2d   : > { %p706_p1 = scmp.lt.s32.totalorder %s497_s16, 3  ;;  %p707_p2 = scmp.ge.s32.totalorder %s497_s16, 1 }
  0x2f   : > { %p157_p5 = pnand %p707_p2, %p706_p1 }
  0x30   : > { %s632_s30 = sand.u32 (!%p157_p5), 1, %s481_s13  }
  0x31   : > { %160 = sbr.rel (%p157_p5) target bundleno = 83 (0x53), region = 28  ;;  %s317_s4 = sshll.u32 (!%p157_p5), %s632_s30, 1 }
  0x32   : > { %s163_s6 = scalar_lea.sflag (!%p157_p5), [#allocation5], %s632_s30  ;;  %s166_s10 = scalar_lea.vmem (!%p157_p5), [#allocation4], %s317_s4 }
  0x38   : > { %468 = dma.done.wait (%p568_p8), %s163_s6, 32  }
  0x39   : > { %470 = vsyncadd (%p568_p8), %s163_s6, 4294967264  ;;  %s190_s5 = scalar_lea.vmem [#allocation7], %s317_s4  ;;  %s320_s8 = sshll.u32 %s489_s0, 5  ;;  %v195_v0 = vld [vmem:[%s166_s10] sm:$0x3] }
  0x3a   : > { %s214_s7 = sshll.u32 %s190_s5, 4  ;;  %v196_v1 = vld [vmem:[%s698_s2] sm:$0x3]  ;;  %s649_s23 = scalar_lea.hbm %s699_s3, %s320_s8  ;;  %s644_s7 = int_to_ptr.vmem [resolvable:$true] %s214_s7 }
  0x3b   : > { %v197_v2 = vadd.f32 %v196_v1, %v195_v0  ;;  %s200_s20 = scalar_lea.sflag [#allocation6], %s632_s30  ;;  %s415_s21 = scalar_lea.vmem %s644_s7, 32 }
  0x3c   : > { %p416_p8 = scmp.ne.s32.totalorder %s644_s7, %s415_s21  ;;  %p708_p9 = scmp.ne.s32.totalorder %s703_s24, 0 }
  0x3d   : > { %198 = vst [vmem:[%s190_s5] sm:$0x3] %v197_v2  ;;  %s500_s0 = smov [#allocation7]  }
  0x3e   : > { %p417_p11 = pnand %p416_p8, %p708_p9  ;;  %s419_s22 = sshll.u32 %s500_s0, 4  ;;  %s420_s22 = int_to_ptr.vmem [resolvable:$false] %s419_s22 }
  0x3f   : > { %s421_s27 = scalar_lea.vmem %s420_s22, 64  ;;  %p422_p7 = scmp.lt.s32.totalorder %s644_s7, %s420_s22 }
  0x40   : > { %p418_p0 = pneg %p417_p11  ;;  %p423_p13 = scmp.lt.s32.totalorder %s421_s27, %s415_s21 }
  0x42   : > { %p424_p3 = por %p423_p13, %p422_p7 }
  0x44   : > { %p425_p6 = pnand %p424_p3, %p418_p0 }
  0x46   : > { %428 = shalt.err (!%p425_p6)
}
  0x47   : > { %s429_s28 = scalar_lea.hbm %s649_s23, 32  ;;  %s433_s4 = scalar_lea.hbm %s699_s3, 64 }
  0x48   : > { %p430_p4 = scmp.ne.s32.totalorder %s649_s23, %s429_s28  ;;  %p434_p1 = scmp.lt.u32.totalorder %s649_s23, %s699_s3 }
  0x49   : > { %p435_p2 = scmp.lt.u32.totalorder %s433_s4, %s429_s28  ;;  %p437_p8 = scmp.lt.u32.totalorder %s429_s28, %s649_s23 }
  0x4a   : > { %p431_p10 = pnand %p430_p4, %p708_p9 }
  0x4b   : > { %p436_p5 = por %p435_p2, %p434_p1 }
  0x4c   : > { %p432_p12 = pneg %p431_p10 }
  0x4d   : > { %p438_p11 = por %p437_p8, %p436_p5 }
  0x4f   : > { %p439_p0 = pnand %p438_p11, %p432_p12 }
  0x51   : > { %442 = shalt.err (!%p439_p0)
}
  0x52   : > { %325 = dma.vmem_to_hbm [thread:$0]  (%p708_p9), %s644_s7, 32, %s649_s23, %s200_s20  }
  0x53 PF: > { %s226_s5 = sand.u32 1, %s477_s12   ;;  %p709_p7 = scmp.ne.s32.totalorder %s704_s26, 0 }
  0x54   : > { %p710_p13 = scmp.ge.s32.totalorder %s497_s16, 2  ;;  %s227_s8 = scalar_lea.sflag [#allocation6], %s226_s5 }
  0x56   : > { %p332_p3 = pnand %p710_p13, %p709_p7 }
  0x58   : > { %472 = dma.done.wait (!%p332_p3), %s227_s8, 32  }
  0x59   : > { %474 = vsyncadd (!%p332_p3), %s227_s8, 4294967264  ;;  %s20_s16 = sadd.s32 1, %s497_s16   ;;  %s711_s12 = smov %s481_s13 }
  0x5a   : > { %p17_p6 = scmp.ge.s32.totalorder %s20_s16, 4   ;;  %s712_s13 = smov %s485_s14 }
  0x5b   : > { %s713_s14 = smov %s577_s25  ;;  %s714_s0 = smov %s493_s15 }
  0x5c   : > { %s715_s15 = smov %s717_s19  ;;  %19 = sbr.rel (!%p17_p6) target bundleno = 6 (0x6), region = 76 }
  0x63   :  { %232 = vsyncpa [#allocation5], 1 }
  0x64   :  { %234 = vsyncpa [#allocation5 + $0x1], 1 }
  0x65   :  { %235 = vsyncpa [#allocation6], 1 }
  0x66   :  { %237 = vsyncpa [#allocation6 + $0x1], 1 }

</bundles_post_ra>
